<compile_context>
chip_gen: v7x
topology: tpu7x:2x2x1
jax: 0.10.0
libtpu: 0.0.40
codegen_flags: <defaults>
</compile_context>

<pallas_src>
import functools

import jax
import jax.numpy as jnp
from jax import lax
from jax.experimental import pallas as pl
from jax.experimental.pallas import tpu as pltpu

KSIZE = 3
DEPTH = 2
CROP = DEPTH * (KSIZE // 2)   # = 2
NTAP = KSIZE * KSIZE          # = 9
LANE = 128
SUBLANE = 8


def _round_up(x, m):
    return ((x + m - 1) // m) * m


def _probe_hw_roll():
    """Use pltpu.roll (single XLU lane rotation) when it is available *and*
    matches jnp.roll semantics in this environment; otherwise fall back to
    jnp.roll (static slice+concat), which always lowers."""
    try:
        def k(x_ref, o_ref):
            o_ref[...] = pltpu.roll(x_ref[...], shift=5, axis=1)

        x = jnp.arange(8 * 128, dtype=jnp.float32).reshape(8, 128)
        y = pl.pallas_call(
            k, out_shape=jax.ShapeDtypeStruct((8, 128), jnp.float32))(x)
        return bool(jnp.allclose(jax.block_until_ready(y),
                                 jnp.roll(x, 5, axis=1)))
    except Exception:
        return False


_USE_HW_ROLL = _probe_hw_roll()


def _vmem_capacity_bytes():
    try:
        info = pltpu.get_tpu_info()
        for name in ("vmem_capacity_bytes", "vmem_size_bytes", "vmem_bytes"):
            v = getattr(info, name, None)
            if v:
                return int(v)
    except Exception:
        pass
    return 64 * 1024 * 1024       # conservative default (v7x per-TC VMEM)


def _tap(a, s, use_hw_roll):
    """_tap(a, s)[:, q] == a[:, (q + s) % L]  (left shift along lanes by s)."""
    L = a.shape[-1]
    s = s % L
    if s == 0:
        return a
    if use_hw_roll:
        return pltpu.roll(a, shift=L - s, axis=1)     # XLU lane rotation
    return jnp.roll(a, shift=L - s, axis=1)           # slice+concat fallback


def _encoder_cresnet_stacked_kernel(x_ref, w1_ref, b1_ref, w2_ref, b2_ref,
                                    o_ref, stack_ref, *, row_stride, cg,
                                    mxu_dtype, use_hw_roll):
    """One lane-dense (Cg, 9*Cg) x (9*Cg, L) MXU matmul per conv.

    x_ref/o_ref: (Cg, L), L = images_per_block * HWp (lane-dense).
    w*_ref:      (Cg, 9*Cg) with w[co, t*Cg + ci] = conv_w[dy_t, dx_t, ci, co].
    b*_ref:      (Cg, 1) float32.
    stack_ref:   (9*Cg, L) VMEM scratch in the MXU dtype (reused by both convs).
    """

    def fill_stack(a):
        for t in range(NTAP):
            dy, dx = divmod(t, KSIZE)
            stack_ref[t * cg:(t + 1) * cg, :] = _tap(
                a, dy * row_stride + dx, use_hw_roll)

    fill_stack(x_ref[...].astype(mxu_dtype))
    # Residual = x shifted by (CROP, CROP) == the (dy,dx)=(2,2) tap; reuse it
    # from the stack instead of rolling x a second time.
    res = stack_ref[(NTAP - 1) * cg:NTAP * cg, :].astype(jnp.float32)

    y1 = jnp.dot(w1_ref[...], stack_ref[...],
                 preferred_element_type=jnp.float32) + b1_ref[...]
    h = jnp.maximum(y1, 0.0)                      # f32 bias + ReLU

    fill_stack(h.astype(mxu_dtype))
    y2 = jnp.dot(w2_ref[...], stack_ref[...],
                 preferred_element_type=jnp.float32) + b2_ref[...]
    o_ref[...] = (y2 + res).astype(o_ref.dtype)


def _encoder_cresnet_loop_kernel(x_ref, w1t_ref, b1_ref, w2t_ref, b2_ref,
                                 o_ref, acc_ref, *, row_stride, mxu_dtype,
                                 use_hw_roll):
    """Large-C fallback: per-tap (Cg,Cg)x(Cg,L) matmuls accumulated into a
    VMEM f32 scratch (avoids the 9x stack VMEM of the stacked form).

    w*t_ref: (9, Cg, Cg) with w[t, co, ci] = conv_w[dy_t, dx_t, ci, co].
    """

    def conv(a_m, wt_ref, init, last_tap=None):
        acc_ref[...] = init
        for t in range(NTAP):
            dy, dx = divmod(t, KSIZE)
            if t == NTAP - 1 and last_tap is not None:
                tap_t = last_tap
            else:
                tap_t = _tap(a_m, dy * row_stride + dx, use_hw_roll)
            acc_ref[...] += jnp.dot(wt_ref[t], tap_t,
                                    preferred_element_type=jnp.float32)
        return acc_ref[...]

    shape = o_ref.shape
    x_m = x_ref[...].astype(mxu_dtype)
    # (2,2) tap of x doubles as the cropped-input residual.
    res_m = _tap(x_m, CROP * row_stride + CROP, use_hw_roll)

    b1 = jnp.broadcast_to(b1_ref[...], shape).astype(jnp.float32)
    h = jnp.maximum(conv(x_m, w1t_ref, b1, last_tap=res_m), 0.0)

    b2 = jnp.broadcast_to(b2_ref[...], shape).astype(jnp.float32)
    y = conv(h.astype(mxu_dtype), w2t_ref, b2 + res_m.astype(jnp.float32))
    o_ref[...] = y.astype(o_ref.dtype)


def encoder_cresnet_block(x_nchw, w1, b1, w2, b2, *,
                          images_per_block=None,
                          mxu_dtype=jnp.bfloat16,
                          out_dtype=jnp.float32,
                          force_path=None):
    """Pallas-TPU forward of EncoderCResNetBlock (depth=2, k=3, 'valid').

    x: (N, C, H, W); w1, w2: (3, 3, C, C) HWIO; b1, b2: (C,).
    Returns (N, C, H-4, W-4) in x.dtype.  MXU operands use `mxu_dtype`
    (default bf16); accumulation, bias, ReLU and the residual add are f32.
    """
    N, C, H, W = x_nchw.shape
    assert H == W, "module crops with x.size(-1); requires square input"
    assert H >= 2 * CROP + 1
    assert w1.shape == (KSIZE, KSIZE, C, C), "residual needs C_in == C_out"
    assert w2.shape == (KSIZE, KSIZE, C, C)
    assert force_path in (None, "stacked", "loop")
    Ho, Wo = H - 2 * CROP, W - 2 * CROP

    mxu_dtype = jax.dtypes.canonicalize_dtype(mxu_dtype)
    mxu_bytes = mxu_dtype.itemsize
    packing = max(1, 4 // mxu_bytes)
    # Channel rows padded so every per-tap slab is aligned to the packed
    # native tile (8 rows for f32, 16 rows for bf16).
    Cg = _round_up(C, SUBLANE * packing)

    HW = H * W
    HWp = _round_up(HW, LANE)        # per-image lane-padded length

    use_stacked = (Cg <= 64) if force_path is None else (force_path == "stacked")

    # ---- VMEM-aware choice of images per grid block ----------------------
    vmem_cap = _vmem_capacity_bytes()
    budget = int(vmem_cap * 0.55)          # live-set budget inside the kernel
    # resident weights + biases (constant index_map -> single buffer)
    fixed = 2 * Cg * NTAP * Cg * mxu_bytes + 2 * Cg * 4
    if use_stacked:
        # 2x dbl-buffered input + 2x dbl-buffered f32 output + 9-tap stack
        # scratch + ~4 full-tile f32 SSA temporaries
        per_lane = Cg * (2 * mxu_bytes + 2 * 4 + NTAP * mxu_bytes + 4 * 4)
    else:
        per_lane = Cg * (2 * mxu_bytes + 2 * 4 + 4 + 4 * 4)
    max_lanes = max(HWp, (budget - fixed) // per_lane)
    nb_cap = max(1, max_lanes // HWp)

    if images_per_block is None:
        # keep >= 2 grid steps so the BlockSpec pipeline overlaps DMA with
        # compute and megacore parts can split the ('parallel',) grid axis.
        nb_cap = min(nb_cap, max(1, N // 2))
        nb = 1
        for d in range(1, N + 1):
            if N % d == 0 and d <= nb_cap:
                nb = d
    else:
        nb = int(images_per_block)
        assert N % nb == 0
    n_blocks = N // nb
    Lb = nb * HWp
    vmem_limit = int(min(vmem_cap * 0.85, 100 * 1024 * 1024))

    # ---- host-side layout: NCHW -> (Cg, N*HWp), channels on sublanes ------
    x_f = jnp.transpose(x_nchw, (1, 0, 2, 3)).reshape(C, N, HW)
    x_f = jnp.pad(x_f, ((0, Cg - C), (0, 0), (0, HWp - HW)))
    x_f = x_f.reshape(Cg, N * HWp).astype(mxu_dtype)

    def prep_b(b):
        return jnp.pad(b.astype(jnp.float32), (0, Cg - C)).reshape(Cg, 1)

    if use_stacked:
        def prep_w(w):  # (3,3,Ci,Co) HWIO -> lane-dense (Cg, 9*Cg)
            ws = jnp.transpose(w, (3, 0, 1, 2)).reshape(C, NTAP, C)
            ws = jnp.pad(ws, ((0, Cg - C), (0, 0), (0, Cg - C)))
            return ws.reshape(Cg, NTAP * Cg).astype(mxu_dtype)
        w_block = (Cg, NTAP * Cg)
        w_index_map = lambda b: (0, 0)
        kernel = functools.partial(
            _encoder_cresnet_stacked_kernel, row_stride=W, cg=Cg,
            mxu_dtype=mxu_dtype, use_hw_roll=_USE_HW_ROLL)
        scratch = [pltpu.VMEM((NTAP * Cg, Lb), mxu_dtype)]
    else:
        def prep_w(w):  # (3,3,Ci,Co) HWIO -> (9, Co=Cg, Ci=Cg)
            wt = jnp.transpose(w, (0, 1, 3, 2)).reshape(NTAP, C, C)
            wt = jnp.pad(wt, ((0, 0), (0, Cg - C), (0, Cg - C)))
            return wt.astype(mxu_dtype)
        w_block = (NTAP, Cg, Cg)
        w_index_map = lambda b: (0, 0, 0)
        kernel = functools.partial(
            _encoder_cresnet_loop_kernel, row_stride=W,
            mxu_dtype=mxu_dtype, use_hw_roll=_USE_HW_ROLL)
        scratch = [pltpu.VMEM((Cg, Lb), jnp.float32)]

    out_flat = pl.pallas_call(
        kernel,
        out_shape=jax.ShapeDtypeStruct((Cg, N * HWp), out_dtype),
        grid=(n_blocks,),
        in_specs=[
            pl.BlockSpec((Cg, Lb), lambda b: (0, b)),
            pl.BlockSpec(w_block, w_index_map),
            pl.BlockSpec((Cg, 1), lambda b: (0, 0)),
            pl.BlockSpec(w_block, w_index_map),
            pl.BlockSpec((Cg, 1), lambda b: (0, 0)),
        ],
        out_specs=pl.BlockSpec((Cg, Lb), lambda b: (0, b)),
        scratch_shapes=scratch,
        compiler_params=pltpu.CompilerParams(
            dimension_semantics=("parallel",),
            vmem_limit_bytes=vmem_limit),
    )(x_f, prep_w(w1), prep_b(b1), prep_w(w2), prep_b(b2))

    # Crop the valid region (top-left of each frame) and restore NCHW.
    out = out_flat[:C].reshape(C, N, HWp)[:, :, :HW]
    out = out.reshape(C, N, H, W)[:, :, :Ho, :Wo]
    return jnp.transpose(out, (1, 0, 2, 3)).astype(x_nchw.dtype)


def _reference_forward(x_nchw, w1, b1, w2, b2):
    """Pure-JAX (XLA) reference of the PyTorch forward (true f32)."""
    x = jnp.transpose(x_nchw, (0, 2, 3, 1))
    dn = ("NHWC", "HWIO", "NHWC")
    hp = lax.Precision.HIGHEST
    h = lax.conv_general_dilated(x, w1, (1, 1), "VALID",
                                 dimension_numbers=dn, precision=hp) + b1
    h = jnp.maximum(h, 0.0)
    y = lax.conv_general_dilated(h, w2, (1, 1), "VALID",
                                 dimension_numbers=dn, precision=hp) + b2
    y = y + x[:, CROP:-CROP, CROP:-CROP, :]
    return jnp.transpose(y, (0, 3, 1, 2))


if __name__ == "__main__":
    # Residual add requires C_in == C_out; small shapes consistent w/ module.
    N, C, H, W = 2, 8, 16, 16

    key = jax.random.PRNGKey(0)
    kx, k1, kb1, k2, kb2 = jax.random.split(key, 5)

    x = jax.random.normal(kx, (N, C, H, W), dtype=jnp.float32)
    scale = 1.0 / (C * KSIZE * KSIZE) ** 0.5
    w1 = jax.random.normal(k1, (KSIZE, KSIZE, C, C), jnp.float32) * scale
    b1 = jax.random.normal(kb1, (C,), jnp.float32) * scale
    w2 = jax.random.normal(k2, (KSIZE, KSIZE, C, C), jnp.float32) * scale
    b2 = jax.random.normal(kb2, (C,), jnp.float32) * scale

    ref = _reference_forward(x, w1, b1, w2, b2)

    # 1) f32 MXU path, stacked single-matmul-per-conv kernel.
    run_f32 = jax.jit(functools.partial(encoder_cresnet_block,
                                        mxu_dtype=jnp.float32))
    out = jax.block_until_ready(run_f32(x, w1, b1, w2, b2))
    assert out.shape == (N, C, H - 2 * CROP, W - 2 * CROP), out.shape
    err = float(jnp.max(jnp.abs(out - ref)))
    assert jnp.allclose(out, ref, atol=2e-2, rtol=2e-2), f"stacked f32 err={err}"

    # 2) per-tap accumulation fallback (large-C form), f32.
    run_loop = jax.jit(functools.partial(encoder_cresnet_block,
                                         mxu_dtype=jnp.float32,
                                         force_path="loop"))
    out_l = jax.block_until_ready(run_loop(x, w1, b1, w2, b2))
    err_l = float(jnp.max(jnp.abs(out_l - ref)))
    assert jnp.allclose(out_l, ref, atol=2e-2, rtol=2e-2), f"loop f32 err={err_l}"

    # 3) default path: bf16 MXU operands, f32 accumulation (loose tolerance).
    run_bf16 = jax.jit(encoder_cresnet_block)
    out_b = jax.block_until_ready(run_bf16(x, w1, b1, w2, b2))
    err_b = float(jnp.max(jnp.abs(out_b - ref)))
    assert jnp.allclose(out_b, ref, atol=8e-2, rtol=8e-2), f"bf16 err={err_b}"

    print("KERNEL_OK")
</pallas_src>

<mosaic_0001>
module attributes {stable_mosaic.version = 11 : i64} {
  func.func @k(%arg0: memref<8x128xf32, #tpu.memory_space<vmem>>, %arg1: memref<8x128xf32, #tpu.memory_space<vmem>>) attributes {dimension_semantics = [], scalar_prefetch = 0 : i64, scratch_operands = 0 : i64, tpu.core_type = #tpu.core_type<tc>} {
    %c0 = arith.constant 0 : index
    %c0_0 = arith.constant 0 : index
    %0 = vector.load %arg0[%c0, %c0_0] : memref<8x128xf32, #tpu.memory_space<vmem>>, vector<8x128xf32>
    %c5_i32 = arith.constant 5 : i32
    %1 = tpu.dynamic_rotate %0 by %c5_i32 dim 1 : vector<8x128xf32>, i32 -> vector<8x128xf32>
    %c0_1 = arith.constant 0 : index
    %c0_2 = arith.constant 0 : index
    %2 = vector.load %arg1[%c0_1, %c0_2] : memref<8x128xf32, #tpu.memory_space<vmem>>, vector<8x128xf32>
    tpu.vector_store %arg1[%c0_1, %c0_2], %1 {strides = array<i32>} : memref<8x128xf32, #tpu.memory_space<vmem>>, vector<8x128xf32>,
    return
  }
}

module attributes {stable_mosaic.version = 11 : i64} {
  func.func @_encoder_cresnet_stacked_kernel(%arg0: i32, %arg1: memref<8x256xf32, #tpu.memory_space<vmem>>, %arg2: memref<8x72xf32, #tpu.memory_space<vmem>>, %arg3: memref<8x1xf32, #tpu.memory_space<vmem>>, %arg4: memref<8x72xf32, #tpu.memory_space<vmem>>, %arg5: memref<8x1xf32, #tpu.memory_space<vmem>>, %arg6: memref<8x256xf32, #tpu.memory_space<vmem>>, %arg7: memref<72x256xf32, #tpu.memory_space<vmem>>) attributes {dimension_semantics = [#tpu.dimension_semantics<parallel>], iteration_bounds = array<i64: 2>, scalar_prefetch = 0 : i64, scratch_operands = 1 : i64, tpu.core_type = #tpu.core_type<tc>, window_params = [{transform_indices = @transform_0, window_bounds = array<i64: 8, 256>}, {pipeline_mode = #tpu.pipeline_mode<synchronous>, transform_indices = @transform_1, window_bounds = array<i64: 8, 72>}, {pipeline_mode = #tpu.pipeline_mode<synchronous>, transform_indices = @transform_2, window_bounds = array<i64: 8, 1>}, {pipeline_mode = #tpu.pipeline_mode<synchronous>, transform_indices = @transform_3, window_bounds = array<i64: 8, 72>}, {pipeline_mode = #tpu.pipeline_mode<synchronous>, transform_indices = @transform_4, window_bounds = array<i64: 8, 1>}, {transform_indices = @transform_5, window_bounds = array<i64: 8, 256>}]} {
    %c0 = arith.constant 0 : index
    %c0_0 = arith.constant 0 : index
    %0 = vector.load %arg1[%c0, %c0_0] : memref<8x256xf32, #tpu.memory_space<vmem>>, vector<8x256xf32>
    %c0_1 = arith.constant 0 : index
    %c0_2 = arith.constant 0 : index
    %1 = vector.load %arg7[%c0_1, %c0_2] : memref<72x256xf32, #tpu.memory_space<vmem>>, vector<8x256xf32>
    tpu.vector_store %arg7[%c0_1, %c0_2], %0 {strides = array<i32>} : memref<72x256xf32, #tpu.memory_space<vmem>>, vector<8x256xf32>,
    %2 = vector.extract_strided_slice %0 {offsets = [0, 1], sizes = [8, 255], strides = [1, 1]} : vector<8x256xf32> to vector<8x255xf32>
    %3 = vector.extract_strided_slice %0 {offsets = [0, 0], sizes = [8, 1], strides = [1, 1]} : vector<8x256xf32> to vector<8x1xf32>
    %4 = tpu.concatenate %2, %3 in 1 : vector<8x255xf32>, vector<8x1xf32> -> vector<8x256xf32>
    %c8 = arith.constant 8 : index
    %c0_3 = arith.constant 0 : index
    %5 = vector.load %arg7[%c8, %c0_3] : memref<72x256xf32, #tpu.memory_space<vmem>>, vector<8x256xf32>
    tpu.vector_store %arg7[%c8, %c0_3], %4 {strides = array<i32>} : memref<72x256xf32, #tpu.memory_space<vmem>>, vector<8x256xf32>,
    %6 = vector.extract_strided_slice %0 {offsets = [0, 2], sizes = [8, 254], strides = [1, 1]} : vector<8x256xf32> to vector<8x254xf32>
    %7 = vector.extract_strided_slice %0 {offsets = [0, 0], sizes = [8, 2], strides = [1, 1]} : vector<8x256xf32> to vector<8x2xf32>
    %8 = tpu.concatenate %6, %7 in 1 : vector<8x254xf32>, vector<8x2xf32> -> vector<8x256xf32>
    %c16 = arith.constant 16 : index
    %c0_4 = arith.constant 0 : index
    %9 = vector.load %arg7[%c16, %c0_4] : memref<72x256xf32, #tpu.memory_space<vmem>>, vector<8x256xf32>
    tpu.vector_store %arg7[%c16, %c0_4], %8 {strides = array<i32>} : memref<72x256xf32, #tpu.memory_space<vmem>>, vector<8x256xf32>,
    %10 = vector.extract_strided_slice %0 {offsets = [0, 16], sizes = [8, 240], strides = [1, 1]} : vector<8x256xf32> to vector<8x240xf32>
    %11 = vector.extract_strided_slice %0 {offsets = [0, 0], sizes = [8, 16], strides = [1, 1]} : vector<8x256xf32> to vector<8x16xf32>
    %12 = tpu.concatenate %10, %11 in 1 : vector<8x240xf32>, vector<8x16xf32> -> vector<8x256xf32>
    %c24 = arith.constant 24 : index
    %c0_5 = arith.constant 0 : index
    %13 = vector.load %arg7[%c24, %c0_5] : memref<72x256xf32, #tpu.memory_space<vmem>>, vector<8x256xf32>
    tpu.vector_store %arg7[%c24, %c0_5], %12 {strides = array<i32>} : memref<72x256xf32, #tpu.memory_space<vmem>>, vector<8x256xf32>,
    %14 = vector.extract_strided_slice %0 {offsets = [0, 17], sizes = [8, 239], strides = [1, 1]} : vector<8x256xf32> to vector<8x239xf32>
    %15 = vector.extract_strided_slice %0 {offsets = [0, 0], sizes = [8, 17], strides = [1, 1]} : vector<8x256xf32> to vector<8x17xf32>
    %16 = tpu.concatenate %14, %15 in 1 : vector<8x239xf32>, vector<8x17xf32> -> vector<8x256xf32>
    %c32 = arith.constant 32 : index
    %c0_6 = arith.constant 0 : index
    %17 = vector.load %arg7[%c32, %c0_6] : memref<72x256xf32, #tpu.memory_space<vmem>>, vector<8x256xf32>
    tpu.vector_store %arg7[%c32, %c0_6], %16 {strides = array<i32>} : memref<72x256xf32, #tpu.memory_space<vmem>>, vector<8x256xf32>,
    %18 = vector.extract_strided_slice %0 {offsets = [0, 18], sizes = [8, 238], strides = [1, 1]} : vector<8x256xf32> to vector<8x238xf32>
    %19 = vector.extract_strided_slice %0 {offsets = [0, 0], sizes = [8, 18], strides = [1, 1]} : vector<8x256xf32> to vector<8x18xf32>
    %20 = tpu.concatenate %18, %19 in 1 : vector<8x238xf32>, vector<8x18xf32> -> vector<8x256xf32>
    %c40 = arith.constant 40 : index
    %c0_7 = arith.constant 0 : index
    %21 = vector.load %arg7[%c40, %c0_7] : memref<72x256xf32, #tpu.memory_space<vmem>>, vector<8x256xf32>
    tpu.vector_store %arg7[%c40, %c0_7], %20 {strides = array<i32>} : memref<72x256xf32, #tpu.memory_space<vmem>>, vector<8x256xf32>,
    %22 = vector.extract_strided_slice %0 {offsets = [0, 32], sizes = [8, 224], strides = [1, 1]} : vector<8x256xf32> to vector<8x224xf32>
    %23 = vector.extract_strided_slice %0 {offsets = [0, 0], sizes = [8, 32], strides = [1, 1]} : vector<8x256xf32> to vector<8x32xf32>
    %24 = tpu.concatenate %22, %23 in 1 : vector<8x224xf32>, vector<8x32xf32> -> vector<8x256xf32>
    %c48 = arith.constant 48 : index
    %c0_8 = arith.constant 0 : index
    %25 = vector.load %arg7[%c48, %c0_8] : memref<72x256xf32, #tpu.memory_space<vmem>>, vector<8x256xf32>
    tpu.vector_store %arg7[%c48, %c0_8], %24 {strides = array<i32>} : memref<72x256xf32, #tpu.memory_space<vmem>>, vector<8x256xf32>,
    %26 = vector.extract_strided_slice %0 {offsets = [0, 33], sizes = [8, 223], strides = [1, 1]} : vector<8x256xf32> to vector<8x223xf32>
    %27 = vector.extract_strided_slice %0 {offsets = [0, 0], sizes = [8, 33], strides = [1, 1]} : vector<8x256xf32> to vector<8x33xf32>
    %28 = tpu.concatenate %26, %27 in 1 : vector<8x223xf32>, vector<8x33xf32> -> vector<8x256xf32>
    %c56 = arith.constant 56 : index
    %c0_9 = arith.constant 0 : index
    %29 = vector.load %arg7[%c56, %c0_9] : memref<72x256xf32, #tpu.memory_space<vmem>>, vector<8x256xf32>
    tpu.vector_store %arg7[%c56, %c0_9], %28 {strides = array<i32>} : memref<72x256xf32, #tpu.memory_space<vmem>>, vector<8x256xf32>,
    %30 = vector.extract_strided_slice %0 {offsets = [0, 34], sizes = [8, 222], strides = [1, 1]} : vector<8x256xf32> to vector<8x222xf32>
    %31 = vector.extract_strided_slice %0 {offsets = [0, 0], sizes = [8, 34], strides = [1, 1]} : vector<8x256xf32> to vector<8x34xf32>
    %32 = tpu.concatenate %30, %31 in 1 : vector<8x222xf32>, vector<8x34xf32> -> vector<8x256xf32>
    %c64 = arith.constant 64 : index
    %c0_10 = arith.constant 0 : index
    %33 = vector.load %arg7[%c64, %c0_10] : memref<72x256xf32, #tpu.memory_space<vmem>>, vector<8x256xf32>
    tpu.vector_store %arg7[%c64, %c0_10], %32 {strides = array<i32>} : memref<72x256xf32, #tpu.memory_space<vmem>>, vector<8x256xf32>,
    %c64_11 = arith.constant 64 : index
    %c0_12 = arith.constant 0 : index
    %34 = vector.load %arg7[%c64_11, %c0_12] : memref<72x256xf32, #tpu.memory_space<vmem>>, vector<8x256xf32>
    %c0_13 = arith.constant 0 : index
    %c0_14 = arith.constant 0 : index
    %35 = vector.load %arg2[%c0_13, %c0_14] : memref<8x72xf32, #tpu.memory_space<vmem>>, vector<8x72xf32>
    %c0_15 = arith.constant 0 : index
    %c0_16 = arith.constant 0 : index
    %36 = vector.load %arg7[%c0_15, %c0_16] : memref<72x256xf32, #tpu.memory_space<vmem>>, vector<72x256xf32>
    %cst = arith.constant dense<0.000000e+00> : vector<8x256xf32>
    %37 = tpu.matmul %35, %36, %cst {dimension_numbers = #tpu.dot_dimension_numbers<[1], [0], [0], [1], [0, 0, 1, 1], [], []>} : vector<8x72xf32>, vector<72x256xf32>, vector<8x256xf32> -> vector<8x256xf32>
    %c0_17 = arith.constant 0 : index
    %c0_18 = arith.constant 0 : index
    %38 = vector.load %arg3[%c0_17, %c0_18] : memref<8x1xf32, #tpu.memory_space<vmem>>, vector<8x1xf32>
    %39 = vector.broadcast %38 : vector<8x1xf32> to vector<8x256xf32>
    %40 = arith.addf %37, %39 : vector<8x256xf32>
    %cst_19 = arith.constant 0.000000e+00 : f32
    %41 = vector.broadcast %cst_19 : f32 to vector<8x256xf32>
    %42 = arith.maximumf %40, %41 : vector<8x256xf32>
    %c0_20 = arith.constant 0 : index
    %c0_21 = arith.constant 0 : index
    %43 = vector.load %arg7[%c0_20, %c0_21] : memref<72x256xf32, #tpu.memory_space<vmem>>, vector<8x256xf32>
    tpu.vector_store %arg7[%c0_20, %c0_21], %42 {strides = array<i32>} : memref<72x256xf32, #tpu.memory_space<vmem>>, vector<8x256xf32>,
    %44 = vector.extract_strided_slice %42 {offsets = [0, 1], sizes = [8, 255], strides = [1, 1]} : vector<8x256xf32> to vector<8x255xf32>
    %45 = vector.extract_strided_slice %42 {offsets = [0, 0], sizes = [8, 1], strides = [1, 1]} : vector<8x256xf32> to vector<8x1xf32>
    %46 = tpu.concatenate %44, %45 in 1 : vector<8x255xf32>, vector<8x1xf32> -> vector<8x256xf32>
    %c8_22 = arith.constant 8 : index
    %c0_23 = arith.constant 0 : index
    %47 = vector.load %arg7[%c8_22, %c0_23] : memref<72x256xf32, #tpu.memory_space<vmem>>, vector<8x256xf32>
    tpu.vector_store %arg7[%c8_22, %c0_23], %46 {strides = array<i32>} : memref<72x256xf32, #tpu.memory_space<vmem>>, vector<8x256xf32>,
    %48 = vector.extract_strided_slice %42 {offsets = [0, 2], sizes = [8, 254], strides = [1, 1]} : vector<8x256xf32> to vector<8x254xf32>
    %49 = vector.extract_strided_slice %42 {offsets = [0, 0], sizes = [8, 2], strides = [1, 1]} : vector<8x256xf32> to vector<8x2xf32>
    %50 = tpu.concatenate %48, %49 in 1 : vector<8x254xf32>, vector<8x2xf32> -> vector<8x256xf32>
    %c16_24 = arith.constant 16 : index
    %c0_25 = arith.constant 0 : index
    %51 = vector.load %arg7[%c16_24, %c0_25] : memref<72x256xf32, #tpu.memory_space<vmem>>, vector<8x256xf32>
    tpu.vector_store %arg7[%c16_24, %c0_25], %50 {strides = array<i32>} : memref<72x256xf32, #tpu.memory_space<vmem>>, vector<8x256xf32>,
    %52 = vector.extract_strided_slice %42 {offsets = [0, 16], sizes = [8, 240], strides = [1, 1]} : vector<8x256xf32> to vector<8x240xf32>
    %53 = vector.extract_strided_slice %42 {offsets = [0, 0], sizes = [8, 16], strides = [1, 1]} : vector<8x256xf32> to vector<8x16xf32>
    %54 = tpu.concatenate %52, %53 in 1 : vector<8x240xf32>, vector<8x16xf32> -> vector<8x256xf32>
    %c24_26 = arith.constant 24 : index
    %c0_27 = arith.constant 0 : index
    %55 = vector.load %arg7[%c24_26, %c0_27] : memref<72x256xf32, #tpu.memory_space<vmem>>, vector<8x256xf32>
    tpu.vector_store %arg7[%c24_26, %c0_27], %54 {strides = array<i32>} : memref<72x256xf32, #tpu.memory_space<vmem>>, vector<8x256xf32>,
    %56 = vector.extract_strided_slice %42 {offsets = [0, 17], sizes = [8, 239], strides = [1, 1]} : vector<8x256xf32> to vector<8x239xf32>
    %57 = vector.extract_strided_slice %42 {offsets = [0, 0], sizes = [8, 17], strides = [1, 1]} : vector<8x256xf32> to vector<8x17xf32>
    %58 = tpu.concatenate %56, %57 in 1 : vector<8x239xf32>, vector<8x17xf32> -> vector<8x256xf32>
    %c32_28 = arith.constant 32 : index
    %c0_29 = arith.constant 0 : index
    %59 = vector.load %arg7[%c32_28, %c0_29] : memref<72x256xf32, #tpu.memory_space<vmem>>, vector<8x256xf32>
    tpu.vector_store %arg7[%c32_28, %c0_29], %58 {strides = array<i32>} : memref<72x256xf32, #tpu.memory_space<vmem>>, vector<8x256xf32>,
    %60 = vector.extract_strided_slice %42 {offsets = [0, 18], sizes = [8, 238], strides = [1, 1]} : vector<8x256xf32> to vector<8x238xf32>
    %61 = vector.extract_strided_slice %42 {offsets = [0, 0], sizes = [8, 18], strides = [1, 1]} : vector<8x256xf32> to vector<8x18xf32>
    %62 = tpu.concatenate %60, %61 in 1 : vector<8x238xf32>, vector<8x18xf32> -> vector<8x256xf32>
    %c40_30 = arith.constant 40 : index
    %c0_31 = arith.constant 0 : index
    %63 = vector.load %arg7[%c40_30, %c0_31] : memref<72x256xf32, #tpu.memory_space<vmem>>, vector<8x256xf32>
    tpu.vector_store %arg7[%c40_30, %c0_31], %62 {strides = array<i32>} : memref<72x256xf32, #tpu.memory_space<vmem>>, vector<8x256xf32>,
    %64 = vector.extract_strided_slice %42 {offsets = [0, 32], sizes = [8, 224], strides = [1, 1]} : vector<8x256xf32> to vector<8x224xf32>
    %65 = vector.extract_strided_slice %42 {offsets = [0, 0], sizes = [8, 32], strides = [1, 1]} : vector<8x256xf32> to vector<8x32xf32>
    %66 = tpu.concatenate %64, %65 in 1 : vector<8x224xf32>, vector<8x32xf32> -> vector<8x256xf32>
    %c48_32 = arith.constant 48 : index
    %c0_33 = arith.constant 0 : index
    %67 = vector.load %arg7[%c48_32, %c0_33] : memref<72x256xf32, #tpu.memory_space<vmem>>, vector<8x256xf32>
    tpu.vector_store %arg7[%c48_32, %c0_33], %66 {strides = array<i32>} : memref<72x256xf32, #tpu.memory_space<vmem>>, vector<8x256xf32>,
    %68 = vector.extract_strided_slice %42 {offsets = [0, 33], sizes = [8, 223], strides = [1, 1]} : vector<8x256xf32> to vector<8x223xf32>
    %69 = vector.extract_strided_slice %42 {offsets = [0, 0], sizes = [8, 33], strides = [1, 1]} : vector<8x256xf32> to vector<8x33xf32>
    %70 = tpu.concatenate %68, %69 in 1 : vector<8x223xf32>, vector<8x33xf32> -> vector<8x256xf32>
    %c56_34 = arith.constant 56 : index
    %c0_35 = arith.constant 0 : index
    %71 = vector.load %arg7[%c56_34, %c0_35] : memref<72x256xf32, #tpu.memory_space<vmem>>, vector<8x256xf32>
    tpu.vector_store %arg7[%c56_34, %c0_35], %70 {strides = array<i32>} : memref<72x256xf32, #tpu.memory_space<vmem>>, vector<8x256xf32>,
    %72 = vector.extract_strided_slice %42 {offsets = [0, 34], sizes = [8, 222], strides = [1, 1]} : vector<8x256xf32> to vector<8x222xf32>
    %73 = vector.extract_strided_slice %42 {offsets = [0, 0], sizes = [8, 34], strides = [1, 1]} : vector<8x256xf32> to vector<8x34xf32>
    %74 = tpu.concatenate %72, %73 in 1 : vector<8x222xf32>, vector<8x34xf32> -> vector<8x256xf32>
    %c64_36 = arith.constant 64 : index
    %c0_37 = arith.constant 0 : index
    %75 = vector.load %arg7[%c64_36, %c0_37] : memref<72x256xf32, #tpu.memory_space<vmem>>, vector<8x256xf32>
    tpu.vector_store %arg7[%c64_36, %c0_37], %74 {strides = array<i32>} : memref<72x256xf32, #tpu.memory_space<vmem>>, vector<8x256xf32>,
    %c0_38 = arith.constant 0 : index
    %c0_39 = arith.constant 0 : index
    %76 = vector.load %arg4[%c0_38, %c0_39] : memref<8x72xf32, #tpu.memory_space<vmem>>, vector<8x72xf32>
    %c0_40 = arith.constant 0 : index
    %c0_41 = arith.constant 0 : index
    %77 = vector.load %arg7[%c0_40, %c0_41] : memref<72x256xf32, #tpu.memory_space<vmem>>, vector<72x256xf32>
    %cst_42 = arith.constant dense<0.000000e+00> : vector<8x256xf32>
    %78 = tpu.matmul %76, %77, %cst_42 {dimension_numbers = #tpu.dot_dimension_numbers<[1], [0], [0], [1], [0, 0, 1, 1], [], []>} : vector<8x72xf32>, vector<72x256xf32>, vector<8x256xf32> -> vector<8x256xf32>
    %c0_43 = arith.constant 0 : index
    %c0_44 = arith.constant 0 : index
    %79 = vector.load %arg5[%c0_43, %c0_44] : memref<8x1xf32, #tpu.memory_space<vmem>>, vector<8x1xf32>
    %80 = vector.broadcast %79 : vector<8x1xf32> to vector<8x256xf32>
    %81 = arith.addf %78, %80 : vector<8x256xf32>
    %82 = arith.addf %81, %34 : vector<8x256xf32>
    %c0_45 = arith.constant 0 : index
    %c0_46 = arith.constant 0 : index
    %83 = vector.load %arg6[%c0_45, %c0_46] : memref<8x256xf32, #tpu.memory_space<vmem>>, vector<8x256xf32>
    tpu.vector_store %arg6[%c0_45, %c0_46], %82 {strides = array<i32>} : memref<8x256xf32, #tpu.memory_space<vmem>>, vector<8x256xf32>,
    return
  }
  func.func @transform_0(%arg0: i32) -> (i32, i32) {
    %c0_i32 = arith.constant 0 : i32
    %c0_i32_0 = arith.constant 0 : i32
    return %c0_i32, %arg0 : i32, i32
  }
  func.func @transform_1(%arg0: i32) -> (i32, i32) {
    %c0_i32 = arith.constant 0 : i32
    %c0_i32_0 = arith.constant 0 : i32
    %c0_i32_1 = arith.constant 0 : i32
    return %c0_i32, %c0_i32_0 : i32, i32
  }
  func.func @transform_2(%arg0: i32) -> (i32, i32) {
    %c0_i32 = arith.constant 0 : i32
    %c0_i32_0 = arith.constant 0 : i32
    %c0_i32_1 = arith.constant 0 : i32
    return %c0_i32, %c0_i32_0 : i32, i32
  }
  func.func @transform_3(%arg0: i32) -> (i32, i32) {
    %c0_i32 = arith.constant 0 : i32
    %c0_i32_0 = arith.constant 0 : i32
    %c0_i32_1 = arith.constant 0 : i32
    return %c0_i32, %c0_i32_0 : i32, i32
  }
  func.func @transform_4(%arg0: i32) -> (i32, i32) {
    %c0_i32 = arith.constant 0 : i32
    %c0_i32_0 = arith.constant 0 : i32
    %c0_i32_1 = arith.constant 0 : i32
    return %c0_i32, %c0_i32_0 : i32, i32
  }
  func.func @transform_5(%arg0: i32) -> (i32, i32) {
    %c0_i32 = arith.constant 0 : i32
    %c0_i32_0 = arith.constant 0 : i32
    return %c0_i32, %arg0 : i32, i32
  }
}

</mosaic_0001>

<bundles_post_ra>
// kernel: tpu_custom_call.1
= control target key start
LH: loop header
LB: loop body
LE: loop exit
PB: predicated region body
PF: predicated region fallthrough
CT: control target
= control target key end

     0   :  { %6 = vsyncpa [#allocation3], 0  ;;  %s128_s0 = inlined_call_operand.hbm [shape: f32[8,128], index: 0, kind: input, shape index: {}]   ;;  %s129_s1 = inlined_call_operand.hbm [shape: f32[8,128], index: 1, kind: output, shape index: {}]  }
   0x1   :  { %7 = vsyncpa [#allocation4], 0  ;;  %s91_s6 = smov [#allocation2]   ;;  %s43_s10 = scalar_lea.hbm %s128_s0, 128 }
   0x2   :  { %s14_s7 = sshll.u32 %s91_s6, 4  ;;  %p44_p0 = scmp.ne.s32.totalorder %s128_s0, %s43_s10  ;;  %s15_s7 = int_to_ptr.vmem [resolvable:$true] %s14_s7 }
   0x3   :  { %p47_p1 = scmp.lt.u32.totalorder %s43_s10, %s128_s0 }
   0x5   :  { %p49_p2 = pnand %p47_p1, %p44_p0 }
   0x7   :  { %52 = shalt.err (!%p49_p2)
}
   0x8   :  { %s53_s15 = scalar_lea.vmem %s15_s7, 128  ;;  %p58_p4 = scmp.lt.s32.totalorder %s15_s7, %s15_s7 }
   0x9   :  { %p54_p3 = scmp.ne.s32.totalorder %s15_s7, %s53_s15  ;;  %p59_p5 = scmp.lt.s32.totalorder %s53_s15, %s53_s15 }
   0xb   :  { %p60_p6 = por %p59_p5, %p58_p4 }
   0xd   :  { %p61_p7 = pnand %p60_p6, %p54_p3 }
   0xf   :  { %64 = shalt.err (!%p61_p7)
}
  0x10   :  { %17 = dma.hbm_to_vmem [thread:$0]  %s128_s0, 128, %s15_s7, [#allocation3]  }
  0x11   :  { %87 = dma.done.wait [#allocation3], 128  }
  0x12   :  { %88 = vsyncadd [#allocation3], 4294967168  ;;  %v21_v0 = vld [vmem:[#allocation2] sm:$0xff]  ;;  %s92_s18 = smov 5   ;;  %s93_s19 = smov [#allocation5]  }
  0x13   :  { %22 = vrot.lane.b32.xlu0 %v21_v0, %s92_s18  ;;  %s31_s20 = sshll.u32 %s93_s19, 4  ;;  %s32_s20 = int_to_ptr.vmem [resolvable:$true] %s31_s20 }
  0x14   :  { %s65_s21 = scalar_lea.vmem %s32_s20, 128  ;;  %p70_p9 = scmp.lt.s32.totalorder %s32_s20, %s32_s20 }
  0x15   :  { %p66_p8 = scmp.ne.s32.totalorder %s32_s20, %s65_s21  ;;  %p71_p10 = scmp.lt.s32.totalorder %s65_s21, %s65_s21 }
  0x17   :  { %p72_p11 = por %p71_p10, %p70_p9 }
  0x19   :  { %p73_p12 = pnand %p72_p11, %p66_p8 }
  0x85   :  { %v23_v1 = vpop.permute.xlu0 %22 }
  0x86   :  { %24 = vst [vmem:[#allocation5] sm:$0xff] %v23_v1 }
  0x87   :  { %76 = shalt.err (!%p73_p12)
}
  0x88   :  { %s77_s0 = scalar_lea.hbm %s129_s1, 128 }
  0x89   :  { %p78_p13 = scmp.ne.s32.totalorder %s129_s1, %s77_s0  ;;  %p81_p0 = scmp.lt.u32.totalorder %s77_s0, %s129_s1 }
  0x8b   :  { %p83_p1 = pnand %p81_p0, %p78_p13 }
  0x8d   :  { %86 = shalt.err (!%p83_p1)
}
  0x8e   :  { %34 = dma.vmem_to_hbm [thread:$0]  %s32_s20, 128, %s129_s1, [#allocation4]  }
  0x8f   :  { %89 = dma.done.wait [#allocation4], 128  }
  0x90   :  { %90 = vsyncadd [#allocation4], 4294967168 }
  0x91   :  { %38 = vsyncpa [#allocation3], 1 }
  0x92   :  { %39 = vsyncpa [#allocation4], 1 }

// kernel: encoder_cresnet_block.1
= control target key start
LH: loop header
LB: loop body
LE: loop exit
PB: predicated region body
PF: predicated region fallthrough
CT: control target
= control target key end

     0   :  { %s866_s18 = smov 0   ;;  %s962_s0 = inlined_call_operand.vmem [shape: f32[8,512], index: 0, kind: input, shape index: {}]   ;;  %s963_s1 = inlined_call_operand.vmem [shape: f32[8,72], index: 1, kind: input, shape index: {}]   ;;  %s964_s2 = inlined_call_operand.vmem [shape: f32[8,1], index: 2, kind: input, shape index: {}]   ;;  %s965_s3 = inlined_call_operand.vmem [shape: f32[8,72], index: 3, kind: input, shape index: {}]   ;;  %s966_s4 = inlined_call_operand.vmem [shape: f32[8,1], index: 4, kind: input, shape index: {}]   ;;  %s967_s5 = inlined_call_operand.vmem [shape: f32[8,512], index: 5, kind: output, shape index: {}]  }
   0x1 LB: > { %s683_s19 = sadd.s32 4294967295, %s824_s18   ;;  %p687_p0 = scmp.ge.s32.totalorder %s824_s18, 1  ;;  %s824_s18 = sphi %s866_s18, %s15_s18  }
   0x2   : > { %p188_p1 = scmp.lt.s32.totalorder %s824_s18, 3 }
   0x4   : > { %p189_p2 = pnand %p687_p0, %p188_p1 }
   0x5   : > { %s688_s20 = sshll.u32 (!%p189_p2), %s683_s19, 1  ;;  %s826_s25 = smov (!%p189_p2), 127   ;;  %v832_v3 = vmov (!%p189_p2), 0.0   ;;  %v833_v4 = vmov (!%p189_p2), 0   ;;  %v349_v5 = vld [vmem:[%s964_s2] sm:$0xff] (!%p189_p2)  ;;  %vm238_vm0 = vcmask (!%p189_p2), 1039360  }
   0x6   : > { %192 = sbr.rel (%p189_p2) target bundleno = 732 (0x2dc), region = 40  ;;  %p217_p3 = scmp.lt.s32.totalorder (!%p189_p2), %s688_s20, 3  ;;  %423 = vmatprep.mubr.f32.mxu0 (!%p189_p2), %v832_v3  ;;  %616 = vmatprep.mubr.f32.mxu1 (!%p189_p2), %v832_v3  ;;  %vm262_vm1 = vcmask (!%p189_p2), 916480   ;;  %vm250_vm2 = vcmask (!%p189_p2), 1031168   ;;  %vm274_vm3 = vcmask (!%p189_p2), 908288   ;;  %vm286_vm4 = vcmask (!%p189_p2), 900096  }
   0x7   : > { %s827_s26 = smov (!%p189_p2), 112   ;;  %s828_s27 = smov (!%p189_p2), 126   ;;  %781 = vset.pattern.permute.xlu1 (!%p189_p2), %v833_v4  ;;  %817 = vset.pattern.permute.xlu0 (!%p189_p2), %v833_v4  ;;  %vm298_vm5 = vcmask (!%p189_p2), 785408   ;;  %vm310_vm6 = vcmask (!%p189_p2), 777216   ;;  %vm322_vm7 = vcmask (!%p189_p2), 769024   ;;  %v332_v53 = vld [vmem:[%s963_s1] sm:$0xff] (!%p189_p2) }
   0x8   : > { %s829_s28 = smov (!%p189_p2), 111   ;;  %s830_s29 = smov (!%p189_p2), 110   ;;  %vm355_vm8 = vcmask (!%p189_p2), 588800   ;;  %v543_v62 = vld [vmem:[%s966_s4] sm:$0xff] (!%p189_p2) }
   0x9   : > { %s831_s30 = smov (!%p189_p2), 96   ;;  %s834_s6 = smov (!%p189_p2), 95  }
   0xa   : > { %s835_s7 = smov (!%p189_p2), 94  }
   0xd   : > { %s969_s20 = smov (!%p217_p3, %s688_s20), 3 }
   0xe   : > { %s689_s21 = sshll.u32 %s969_s20, 3 }
   0xf   : > { %s220_s24 = scalar_lea.vmem %s962_s0, %s689_s21  ;;  %s226_s19 = scalar_lea.vmem %s967_s5, %s689_s21 }
  0x10   : > { %v228_v0 = vld [vmem:[%s220_s24] sm:$0xff]  ;;  %v229_v1 = vld [vmem:[%s220_s24 + $0x8] sm:$0xff] }
  0x11   : > { %v746_v2 = vpack.i.bf16 %v229_v1, %v228_v0 }
  0x13   : > { %747 = vrot.lane.b32.xlu0 %v746_v2, %s826_s25  ;;  %757 = vrot.lane.b32.xlu1 %v746_v2, %s827_s26 }
  0x17   : > { %752 = vrot.lane.b32.xlu0 %v746_v2, %s828_s27  ;;  %762 = vrot.lane.b32.xlu1 %v746_v2, %s829_s28 }
  0x1b   : > { %767 = vrot.lane.b32.xlu0 %v746_v2, %s830_s29  ;;  %772 = vrot.lane.b32.xlu1 %v746_v2, %s831_s30 }
  0x1f   : > { %777 = vrot.lane.b32.xlu0 %v746_v2, %s834_s6  ;;  %318 = vrot.lane.b32.xlu1 %v228_v0, %s835_s7 }
  0x23   : > { %320 = vrot.lane.b32.xlu0 %v229_v1, %s835_s7  ;;  %352 = vperm.xlu1 %781, %v349_v5  }
  0x85   : > { %v748_v6 = vpop.permute.xlu0 %747  ;;  %v758_v7 = vpop.permute.xlu1 %757 }
  0x86   : > { %v750_v8 = vunpack.i.h.bf16 %v748_v6  ;;  %v749_v9 = vunpack.i.l.bf16 %v748_v6  ;;  %v760_v10 = vunpack.i.h.bf16 %v758_v7  ;;  %v759_v11 = vunpack.i.l.bf16 %v758_v7 }
  0x88   : > { %v243_v12 = vsel %vm238_vm0, %v750_v8, %v749_v9  ;;  %v239_v13 = vsel %vm238_vm0, %v749_v9, %v750_v8  ;;  %v267_v18 = vsel %vm262_vm1, %v760_v10, %v759_v11  ;;  %v263_v19 = vsel %vm262_vm1, %v759_v11, %v760_v10 }
  0x89   : > { %v753_v14 = vpop.permute.xlu0 %752  ;;  %v696_v15 = vpack.c.bf16 %v243_v12, %v229_v1  ;;  %v698_v16 = vpack.c.bf16 %v239_v13, %v228_v0  ;;  %v763_v17 = vpop.permute.xlu1 %762 }
  0x8a   : > { %v755_v20 = vunpack.i.h.bf16 %v753_v14  ;;  %v754_v21 = vunpack.i.l.bf16 %v753_v14  ;;  %v765_v22 = vunpack.i.h.bf16 %v763_v17  ;;  %v764_v23 = vunpack.i.l.bf16 %v763_v17 }
  0x8b   : > { %697 = vmatprep.subr.bf16.mxu0 %v696_v15 }
  0x8c   : > { %699 = vmatpush1.bf16.msra.mxu0 %v698_v16  ;;  %v255_v24 = vsel %vm250_vm2, %v755_v20, %v754_v21  ;;  %v251_v25 = vsel %vm250_vm2, %v754_v21, %v755_v20  ;;  %v279_v30 = vsel %vm274_vm3, %v765_v22, %v764_v23  ;;  %v275_v31 = vsel %vm274_vm3, %v764_v23, %v765_v22 }
  0x8d   : > { %v768_v26 = vpop.permute.xlu0 %767  ;;  %v700_v27 = vpack.c.bf16 %v267_v18, %v255_v24  ;;  %v702_v28 = vpack.c.bf16 %v263_v19, %v251_v25  ;;  %v773_v29 = vpop.permute.xlu1 %772 }
  0x8e   : > { %v770_v32 = vunpack.i.h.bf16 %v768_v26  ;;  %v769_v33 = vunpack.i.l.bf16 %v768_v26  ;;  %v775_v34 = vunpack.i.h.bf16 %v773_v29  ;;  %v774_v35 = vunpack.i.l.bf16 %v773_v29 }
  0x8f   : > { %701 = vmatprep.subr.bf16.mxu0 %v700_v27 }
  0x90   : > { %703 = vmatpush1.bf16.msra.mxu0 %v702_v28  ;;  %v291_v36 = vsel %vm286_vm4, %v770_v32, %v769_v33  ;;  %v287_v37 = vsel %vm286_vm4, %v769_v33, %v770_v32  ;;  %v303_v43 = vsel %vm298_vm5, %v775_v34, %v774_v35  ;;  %v299_v44 = vsel %vm298_vm5, %v774_v35, %v775_v34 }
  0x91   : > { %v778_v38 = vpop.permute.xlu0 %777  ;;  %v704_v39 = vpack.c.bf16 %v291_v36, %v279_v30  ;;  %v706_v40 = vpack.c.bf16 %v287_v37, %v275_v31  ;;  %v319_v45 = vpop.permute.xlu1 %318 }
  0x92   : > { %v780_v41 = vunpack.i.h.bf16 %v778_v38  ;;  %v779_v42 = vunpack.i.l.bf16 %v778_v38 }
  0x93   : > { %705 = vmatprep.subr.bf16.mxu0 %v704_v39 }
  0x94   : > { %707 = vmatpush1.bf16.msra.mxu0 %v706_v40  ;;  %v315_v46 = vsel %vm310_vm6, %v780_v41, %v779_v42  ;;  %v311_v47 = vsel %vm310_vm6, %v779_v42, %v780_v41 }
  0x95   : > { %v708_v48 = vpack.c.bf16 %v315_v46, %v303_v43  ;;  %v710_v49 = vpack.c.bf16 %v311_v47, %v299_v44  ;;  %v321_v50 = vpop.permute.xlu0 %320 }
  0x96   : > { %v909_v51 = vsel %vm322_vm7, %v321_v50, %v319_v45  ;;  %v913_v52 = vsel %vm322_vm7, %v319_v45, %v321_v50  ;;  %v524_v45 = vld [vmem:[%s965_s3] sm:$0xff] }
  0x97   : > { %709 = vmatprep.subr.bf16.mxu0 %v708_v48 }
  0x98   : > { %711 = vmatpush1.bf16.msra.mxu0 %v710_v49 }
  0x99   : > { %375 = vmatprep.subr.mxu0 %v909_v51 }
  0x9c   : > { %376 = vmatpush1.msra.mxu0 %v913_v52 }
  0x9d   : > { %692 = vmatmul.mubr.msk.f32.vlgmr.msra.gmra.mrb[0].mxu0 %vm355_vm8, %v332_v53 }
  0xa2   : > { %v353_v54 = vpop.permute.xlu1 %352 }
 0x170   : > { %v425_v55 = vpop.f32.mrb[0].mxu0 }
 0x171   : > { %v426_v56 = vadd.f32 %v425_v55, %v353_v54  ;;  %v427_v57 = vpop.f32.mrb[1].mxu0 }
 0x172   : > { %v428_v58 = vadd.f32 %v427_v57, %v353_v54 }
 0x173   : > { %v430_v59 = vmax.f32 %v426_v56, 0.0 }
 0x174   : > { %v431_v60 = vmax.f32 %v428_v58, 0.0 }
 0x176   : > { %v787_v61 = vpack.i.bf16 %v431_v60, %v430_v59 }
 0x178   : > { %788 = vrot.lane.b32.xlu1 %v787_v61, %s828_s27  ;;  %783 = vrot.lane.b32.xlu0 %v787_v61, %s826_s25 }
 0x17c   : > { %798 = vrot.lane.b32.xlu1 %v787_v61, %s829_s28  ;;  %793 = vrot.lane.b32.xlu0 %v787_v61, %s827_s26 }
 0x180   : > { %808 = vrot.lane.b32.xlu1 %v787_v61, %s831_s30  ;;  %803 = vrot.lane.b32.xlu0 %v787_v61, %s830_s29 }
 0x184   : > { %513 = vrot.lane.b32.xlu1 %v430_v59, %s835_s7  ;;  %813 = vrot.lane.b32.xlu0 %v787_v61, %s834_s6 }
 0x188   : > { %546 = vperm.xlu1 %781, %v543_v62   ;;  %515 = vrot.lane.b32.xlu0 %v431_v60, %s835_s7 }
 0x1ea   : > { %v789_v63 = vpop.permute.xlu1 %788  ;;  %v784_v0 = vpop.permute.xlu0 %783 }
 0x1eb   : > { %v786_v1 = vunpack.i.h.bf16 %v784_v0  ;;  %v785_v2 = vunpack.i.l.bf16 %v784_v0  ;;  %v791_v3 = vunpack.i.h.bf16 %v789_v63  ;;  %v790_v4 = vunpack.i.l.bf16 %v789_v63 }
 0x1ed   : > { %v444_v5 = vsel %vm238_vm0, %v786_v1, %v785_v2  ;;  %v440_v6 = vsel %vm238_vm0, %v785_v2, %v786_v1  ;;  %v455_v15 = vsel %vm250_vm2, %v791_v3, %v790_v4  ;;  %v451_v17 = vsel %vm250_vm2, %v790_v4, %v791_v3 }
 0x1ee   : > { %v799_v7 = vpop.permute.xlu1 %798  ;;  %v794_v8 = vpop.permute.xlu0 %793  ;;  %v712_v9 = vpack.c.bf16 %v444_v5, %v431_v60  ;;  %v714_v10 = vpack.c.bf16 %v440_v6, %v430_v59 }
 0x1ef   : > { %v796_v11 = vunpack.i.h.bf16 %v794_v8  ;;  %v795_v12 = vunpack.i.l.bf16 %v794_v8  ;;  %v801_v13 = vunpack.i.h.bf16 %v799_v7  ;;  %v800_v14 = vunpack.i.l.bf16 %v799_v7 }
 0x1f0   : > { %713 = vmatprep.subr.bf16.mxu1 %v712_v9 }
 0x1f1   : > { %715 = vmatpush1.bf16.msra.mxu1 %v714_v10  ;;  %v466_v16 = vsel %vm262_vm1, %v796_v11, %v795_v12  ;;  %v462_v18 = vsel %vm262_vm1, %v795_v12, %v796_v11  ;;  %v477_v25 = vsel %vm274_vm3, %v801_v13, %v800_v14  ;;  %v473_v26 = vsel %vm274_vm3, %v800_v14, %v801_v13 }
 0x1f2   : > { %v809_v19 = vpop.permute.xlu1 %808  ;;  %v804_v20 = vpop.permute.xlu0 %803  ;;  %v716_v21 = vpack.c.bf16 %v466_v16, %v455_v15  ;;  %v718_v22 = vpack.c.bf16 %v462_v18, %v451_v17 }
 0x1f3   : > { %v806_v23 = vunpack.i.h.bf16 %v804_v20  ;;  %v805_v24 = vunpack.i.l.bf16 %v804_v20  ;;  %v811_v27 = vunpack.i.h.bf16 %v809_v19  ;;  %v810_v28 = vunpack.i.l.bf16 %v809_v19 }
 0x1f4   : > { %717 = vmatprep.subr.bf16.mxu1 %v716_v21 }
 0x1f5   : > { %719 = vmatpush1.bf16.msra.mxu1 %v718_v22  ;;  %v488_v29 = vsel %vm286_vm4, %v806_v23, %v805_v24  ;;  %v484_v30 = vsel %vm286_vm4, %v805_v24, %v806_v23  ;;  %v499_v36 = vsel %vm298_vm5, %v811_v27, %v810_v28  ;;  %v495_v38 = vsel %vm298_vm5, %v810_v28, %v811_v27 }
 0x1f6   : > { %v814_v31 = vpop.permute.xlu0 %813  ;;  %v720_v32 = vpack.c.bf16 %v488_v29, %v477_v25  ;;  %v722_v33 = vpack.c.bf16 %v484_v30, %v473_v26  ;;  %v514_v43 = vpop.permute.xlu1 %513 }
 0x1f7   : > { %v816_v34 = vunpack.i.h.bf16 %v814_v31  ;;  %v815_v35 = vunpack.i.l.bf16 %v814_v31 }
 0x1f8   : > { %721 = vmatprep.subr.bf16.mxu1 %v720_v32 }
 0x1f9   : > { %723 = vmatpush1.bf16.msra.mxu1 %v722_v33  ;;  %v510_v37 = vsel %vm310_vm6, %v816_v34, %v815_v35  ;;  %v506_v39 = vsel %vm310_vm6, %v815_v35, %v816_v34 }
 0x1fa   : > { %v516_v40 = vpop.permute.xlu0 %515  ;;  %v724_v41 = vpack.c.bf16 %v510_v37, %v499_v36  ;;  %v726_v42 = vpack.c.bf16 %v506_v39, %v495_v38 }
 0x1fb   : > { %v521_v44 = vsel %vm322_vm7, %v516_v40, %v514_v43  ;;  %v517_v46 = vsel %vm322_vm7, %v514_v43, %v516_v40 }
 0x1fc   : > { %725 = vmatprep.subr.bf16.mxu1 %v724_v41 }
 0x1fd   : > { %727 = vmatpush1.bf16.msra.mxu1 %v726_v42 }
 0x1fe   : > { %568 = vmatprep.subr.mxu1 %v521_v44 }
 0x201   : > { %569 = vmatpush1.msra.mxu1 %v517_v46 }
 0x202   : > { %693 = vmatmul.mubr.msk.f32.vlgmr.msra.gmra.mrb[0].mxu1 %vm355_vm8, %v524_v45 }
 0x207   : > { %v547_v47 = vpop.permute.xlu1 %546 }
 0x2d5   : > { %v618_v48 = vpop.f32.mrb[0].mxu1 }
 0x2d6   : > { %v619_v49 = vadd.f32 %v618_v48, %v547_v47  ;;  %v620_v50 = vpop.f32.mrb[1].mxu1 }
 0x2d7   : > { %v621_v53 = vadd.f32 %v620_v50, %v547_v47 }
 0x2d8   : > { %v623_v54 = vadd.f32 %v619_v49, %v913_v52 }
 0x2d9   : > { %v624_v55 = vadd.f32 %v621_v53, %v909_v51 }
 0x2da   : > { %625 = vst [vmem:[%s226_s19] sm:$0xff] %v623_v54 }
 0x2db   : > { %626 = vst [vmem:[%s226_s19 + $0x8] sm:$0xff] %v624_v55 }
 0x2dc PF: > { %s15_s18 = sadd.s32 1, %s824_s18  }
 0x2dd   : > { %p12_p4 = scmp.ge.s32.totalorder %s15_s18, 4  }
 0x2df   :  { %14 = sbr.rel (!%p12_p4) target bundleno = 1 (0x1), region = 70 }

</bundles_post_ra>
